<compile_context>
chip_gen: v7x
topology: tpu7x:2x2x1
jax: 0.10.0
libtpu: 0.0.40
codegen_flags: <defaults>
</compile_context>

<pallas_src>
import math
import functools

import jax
import jax.numpy as jnp
from jax import lax
from jax.experimental import pallas as pl
from jax.experimental.pallas import tpu as pltpu

EPS = 1e-12  # F.normalize default eps


def _round_up(v, m):
    return ((v + m - 1) // m) * m


def _pearface_kernel(label_ref, x_ref, wmean_ref, wcn_ref, out_ref,
                     *, s, cos_m, sin_m, th, mm, tc, use_bf16):
    x = x_ref[...].astype(jnp.float32)      # (TB, E)
    wmean = wmean_ref[...]                  # (1, E)
    wcn = wcn_ref[...]                      # (TC, E), rows pre-normalized
    label = label_ref[...]                  # (TB, 1) int32

    # x = F.normalize(x): x / max(||x||, eps)  ==  x * rsqrt(max(sum(x^2), eps^2))
    inv_xn = lax.rsqrt(jnp.maximum(jnp.sum(x * x, axis=1, keepdims=True), EPS * EPS))
    xn = x * inv_xn

    # input_centered = xn - weight_mean ; F.normalize(input_centered)
    ic = xn - wmean
    inv_icn = lax.rsqrt(jnp.maximum(jnp.sum(ic * ic, axis=1, keepdims=True), EPS * EPS))
    icn = ic * inv_icn

    # pearson = F.linear(icn, wcn): (TB,E) x (TC,E) contracted on E, no transpose.
    if use_bf16:
        lhs = icn.astype(jnp.bfloat16)
        rhs = wcn.astype(jnp.bfloat16)
    else:
        lhs, rhs = icn, wcn
    cosine = lax.dot_general(
        lhs, rhs,
        dimension_numbers=(((1,), (1,)), ((), ())),
        preferred_element_type=jnp.float32,
    )  # (TB, TC)

    # sine = sqrt(clamp(1 - cos^2, 0, 1)); margin math in f32 on the VPU.
    sine = jnp.sqrt(jnp.clip(1.0 - cosine * cosine, 0.0, 1.0))
    phi = cosine * cos_m - sine * sin_m
    phi = jnp.where(cosine > th, phi, cosine - mm)

    # output = cosine; output[range(B), label] = phi[range(B), label]
    tb = cosine.shape[0]
    col = jax.lax.broadcasted_iota(jnp.int32, (tb, tc), 1) + pl.program_id(1) * tc
    is_target = col == label                 # (TB, TC) via (TB, 1) broadcast
    out = jnp.where(is_target, phi, cosine)

    out_ref[...] = (out * s).astype(out_ref.dtype)


def pearface_forward(x, label, weight, *, s=30.0, m=0.5, use_bf16_matmul=False):
    """Faithful port of PearFace.forward (including its quirks: weight_mean comes
    from the row-normalized weight, but weight_centered uses the RAW weight;
    input_mean is computed-but-unused in the original)."""
    B, E = x.shape
    C, E2 = weight.shape
    assert E == E2

    cos_m = math.cos(m)
    sin_m = math.sin(m)
    th = math.cos(math.pi - m)
    mm = math.sin(math.pi - m) * m

    # ---- parameter-only glue (plain JAX; cache across steps in real training) ----
    w = weight.astype(jnp.float32)
    w_rownorm = jnp.sqrt(jnp.sum(w * w, axis=1, keepdims=True))
    w_n = w / w_rownorm                                       # weight / weight.norm(dim=1)
    w_mean = jnp.mean(w_n, axis=0, keepdims=True)             # (1, E)
    wc = w - w_mean                                           # raw weight centered
    wcn = wc * lax.rsqrt(jnp.maximum(jnp.sum(wc * wc, axis=1, keepdims=True),
                                     EPS * EPS))              # F.normalize(weight_centered)

    # ---- tiling: lane-dense output (TC multiple of 128), TB multiple of 8 ----
    TB = min(128, _round_up(B, 8))
    TC = min(512, _round_up(C, 128))
    Bp = _round_up(B, TB)
    Cp = _round_up(C, TC)

    x_p = x if Bp == B else jnp.pad(x, ((0, Bp - B), (0, 0)))
    label2d = label.astype(jnp.int32).reshape(B, 1)
    label_p = label2d if Bp == B else jnp.pad(label2d, ((0, Bp - B), (0, 0)))
    wcn_p = wcn if Cp == C else jnp.pad(wcn, ((0, Cp - C), (0, 0)))

    kernel = functools.partial(_pearface_kernel, s=s, cos_m=cos_m, sin_m=sin_m,
                               th=th, mm=mm, tc=TC, use_bf16=use_bf16_matmul)

    grid = (Bp // TB, Cp // TC)

    out = pl.pallas_call(
        kernel,
        out_shape=jax.ShapeDtypeStruct((Bp, Cp), jnp.float32),
        grid=grid,
        in_specs=[
            pl.BlockSpec((TB, 1), lambda i, j: (i, 0)),    # label (per-row, B axis only)
            pl.BlockSpec((TB, E), lambda i, j: (i, 0)),    # x (resident across C axis)
            pl.BlockSpec((1, E), lambda i, j: (0, 0)),     # weight_mean
            pl.BlockSpec((TC, E), lambda i, j: (j, 0)),    # normalized centered weight
        ],
        out_specs=pl.BlockSpec((TB, TC), lambda i, j: (i, j)),
        compiler_params=pltpu.CompilerParams(
            dimension_semantics=("parallel", "parallel")),
    )(label_p, x_p, w_mean, wcn_p)

    return out[:B, :C]


def pearface_reference(x, label, weight, *, s=30.0, m=0.5):
    """Pure-JAX reference for validation."""
    cos_m, sin_m = math.cos(m), math.sin(m)
    th, mm_ = math.cos(math.pi - m), math.sin(math.pi - m) * m
    xn = x / jnp.maximum(jnp.linalg.norm(x, axis=1, keepdims=True), EPS)
    w_n = weight / jnp.linalg.norm(weight, axis=1, keepdims=True)
    w_mean = jnp.mean(w_n, axis=0, keepdims=True)
    ic = xn - w_mean
    icn = ic / jnp.maximum(jnp.linalg.norm(ic, axis=1, keepdims=True), EPS)
    wc = weight - w_mean
    wcn = wc / jnp.maximum(jnp.linalg.norm(wc, axis=1, keepdims=True), EPS)
    cosine = icn @ wcn.T
    sine = jnp.sqrt(jnp.clip(1.0 - cosine ** 2, 0.0, 1.0))
    phi = cosine * cos_m - sine * sin_m
    phi = jnp.where(cosine > th, phi, cosine - mm_)
    onehot = jax.nn.one_hot(label, weight.shape[0], dtype=bool)
    return jnp.where(onehot, phi, cosine) * s


if __name__ == "__main__":
    B, E, C = 8, 32, 16   # batch, embedding_size, class_num (toy sizes)

    key = jax.random.PRNGKey(0)
    kx, kw, kl = jax.random.split(key, 3)

    x = jax.random.normal(kx, (B, E), dtype=jnp.float32)
    # xavier_uniform_ for (class_num, embedding_size): bound = sqrt(6/(fan_in+fan_out))
    bound = math.sqrt(6.0 / (E + C))
    weight = jax.random.uniform(kw, (C, E), minval=-bound, maxval=bound,
                                dtype=jnp.float32)
    label = jax.random.randint(kl, (B,), 0, C, dtype=jnp.int32)

    out = pearface_forward(x, label, weight)
    out = jax.block_until_ready(out)

    ref = pearface_reference(x, label, weight)
    assert out.shape == (B, C)
    assert jnp.allclose(out, ref, atol=1e-4, rtol=1e-4), "mismatch vs reference"

    # Also exercise a multi-tile grid (several blocks along both axes) for coverage.
    B2, E2, C2 = 24, 64, 300
    x2 = jax.random.normal(kx, (B2, E2), dtype=jnp.float32)
    bound2 = math.sqrt(6.0 / (E2 + C2))
    w2 = jax.random.uniform(kw, (C2, E2), minval=-bound2, maxval=bound2,
                            dtype=jnp.float32)
    l2 = jax.random.randint(kl, (B2,), 0, C2, dtype=jnp.int32)
    out2 = jax.block_until_ready(pearface_forward(x2, l2, w2))
    ref2 = pearface_reference(x2, l2, w2)
    assert jnp.allclose(out2, ref2, atol=1e-4, rtol=1e-4), "mismatch vs reference (tiled)"

    print("KERNEL_OK")
</pallas_src>

<mosaic_0001>
module attributes {stable_mosaic.version = 11 : i64} {
  func.func @_pearface_kernel(%arg0: i32, %arg1: i32, %arg2: memref<8x1xi32, #tpu.memory_space<vmem>>, %arg3: memref<8x32xf32, #tpu.memory_space<vmem>>, %arg4: memref<1x32xf32, #tpu.memory_space<vmem>>, %arg5: memref<128x32xf32, #tpu.memory_space<vmem>>, %arg6: memref<8x128xf32, #tpu.memory_space<vmem>>) attributes {dimension_semantics = [#tpu.dimension_semantics<parallel>, #tpu.dimension_semantics<parallel>], iteration_bounds = array<i64: 1, 1>, scalar_prefetch = 0 : i64, scratch_operands = 0 : i64, tpu.core_type = #tpu.core_type<tc>, window_params = [{transform_indices = @transform_0, window_bounds = array<i64: 8, 1>}, {transform_indices = @transform_1, window_bounds = array<i64: 8, 32>}, {pipeline_mode = #tpu.pipeline_mode<synchronous>, transform_indices = @transform_2, window_bounds = array<i64: 1, 32>}, {transform_indices = @transform_3, window_bounds = array<i64: 128, 32>}, {transform_indices = @transform_4, window_bounds = array<i64: 8, 128>}]} {
    %c0 = arith.constant 0 : index
    %c0_0 = arith.constant 0 : index
    %0 = vector.load %arg3[%c0, %c0_0] : memref<8x32xf32, #tpu.memory_space<vmem>>, vector<8x32xf32>
    %c0_1 = arith.constant 0 : index
    %c0_2 = arith.constant 0 : index
    %1 = vector.load %arg4[%c0_1, %c0_2] : memref<1x32xf32, #tpu.memory_space<vmem>>, vector<1x32xf32>
    %c0_3 = arith.constant 0 : index
    %c0_4 = arith.constant 0 : index
    %2 = vector.load %arg5[%c0_3, %c0_4] : memref<128x32xf32, #tpu.memory_space<vmem>>, vector<128x32xf32>
    %c0_5 = arith.constant 0 : index
    %c0_6 = arith.constant 0 : index
    %3 = vector.load %arg2[%c0_5, %c0_6] : memref<8x1xi32, #tpu.memory_space<vmem>>, vector<8x1xi32>
    %4 = arith.mulf %0, %0 : vector<8x32xf32>
    %cst = arith.constant dense<0.000000e+00> : vector<8xf32>
    %5 = vector.multi_reduction <add>, %4, %cst [1] : vector<8x32xf32> to vector<8xf32>
    %6 = vector.shape_cast %5 : vector<8xf32> to vector<8x1xf32>
    %cst_7 = arith.constant 1.000000e-24 : f32
    %7 = vector.broadcast %cst_7 : f32 to vector<8x1xf32>
    %8 = arith.maximumf %6, %7 : vector<8x1xf32>
    %9 = math.rsqrt %8 : vector<8x1xf32>
    %10 = vector.broadcast %9 : vector<8x1xf32> to vector<8x32xf32>
    %11 = arith.mulf %0, %10 : vector<8x32xf32>
    %12 = vector.broadcast %1 : vector<1x32xf32> to vector<8x32xf32>
    %13 = arith.subf %11, %12 : vector<8x32xf32>
    %14 = arith.mulf %13, %13 : vector<8x32xf32>
    %cst_8 = arith.constant dense<0.000000e+00> : vector<8xf32>
    %15 = vector.multi_reduction <add>, %14, %cst_8 [1] : vector<8x32xf32> to vector<8xf32>
    %16 = vector.shape_cast %15 : vector<8xf32> to vector<8x1xf32>
    %cst_9 = arith.constant 1.000000e-24 : f32
    %17 = vector.broadcast %cst_9 : f32 to vector<8x1xf32>
    %18 = arith.maximumf %16, %17 : vector<8x1xf32>
    %19 = math.rsqrt %18 : vector<8x1xf32>
    %20 = vector.broadcast %19 : vector<8x1xf32> to vector<8x32xf32>
    %21 = arith.mulf %13, %20 : vector<8x32xf32>
    %cst_10 = arith.constant dense<0.000000e+00> : vector<8x128xf32>
    %22 = tpu.matmul %21, %2, %cst_10 {dimension_numbers = #tpu.dot_dimension_numbers<[1], [1], [0], [0], [0, 0, 1, 0], [], []>} : vector<8x32xf32>, vector<128x32xf32>, vector<8x128xf32> -> vector<8x128xf32>
    %23 = arith.mulf %22, %22 : vector<8x128xf32>
    %cst_11 = arith.constant 1.000000e+00 : f32
    %24 = vector.broadcast %cst_11 : f32 to vector<8x128xf32>
    %25 = arith.subf %24, %23 : vector<8x128xf32>
    %cst_12 = arith.constant 0.000000e+00 : f32
    %cst_13 = arith.constant 1.000000e+00 : f32
    %26 = vector.broadcast %cst_12 : f32 to vector<8x128xf32>
    %27 = arith.maximumf %26, %25 : vector<8x128xf32>
    %28 = vector.broadcast %cst_13 : f32 to vector<8x128xf32>
    %29 = arith.minimumf %28, %27 : vector<8x128xf32>
    %30 = math.sqrt %29 : vector<8x128xf32>
    %cst_14 = arith.constant 0.87758255 : f32
    %31 = vector.broadcast %cst_14 : f32 to vector<8x128xf32>
    %32 = arith.mulf %22, %31 : vector<8x128xf32>
    %cst_15 = arith.constant 0.47942555 : f32
    %33 = vector.broadcast %cst_15 : f32 to vector<8x128xf32>
    %34 = arith.mulf %30, %33 : vector<8x128xf32>
    %35 = arith.subf %32, %34 : vector<8x128xf32>
    %cst_16 = arith.constant -0.87758255 : f32
    %36 = vector.broadcast %cst_16 : f32 to vector<8x128xf32>
    %37 = arith.cmpf ogt, %22, %36 : vector<8x128xf32>
    %cst_17 = arith.constant 0.239712775 : f32
    %38 = vector.broadcast %cst_17 : f32 to vector<8x128xf32>
    %39 = arith.subf %22, %38 : vector<8x128xf32>
    %40 = arith.select %37, %35, %39 : vector<8x128xi1>, vector<8x128xf32>
    %41 = tpu.iota {dimensions = array<i32: 1>} : vector<8x128xi32>
    %c128_i32 = arith.constant 128 : i32
    %42 = arith.muli %arg1, %c128_i32 : i32
    %43 = vector.broadcast %42 : i32 to vector<8x128xi32>
    %44 = arith.addi %41, %43 : vector<8x128xi32>
    %45 = vector.broadcast %3 : vector<8x1xi32> to vector<8x128xi32>
    %46 = arith.cmpi eq, %44, %45 : vector<8x128xi32>
    %47 = arith.select %46, %40, %22 : vector<8x128xi1>, vector<8x128xf32>
    %cst_18 = arith.constant 3.000000e+01 : f32
    %48 = vector.broadcast %cst_18 : f32 to vector<8x128xf32>
    %49 = arith.mulf %47, %48 : vector<8x128xf32>
    %c0_19 = arith.constant 0 : index
    %c0_20 = arith.constant 0 : index
    %50 = vector.load %arg6[%c0_19, %c0_20] : memref<8x128xf32, #tpu.memory_space<vmem>>, vector<8x128xf32>
    tpu.vector_store %arg6[%c0_19, %c0_20], %49 {strides = array<i32>} : memref<8x128xf32, #tpu.memory_space<vmem>>, vector<8x128xf32>,
    return
  }
  func.func @transform_0(%arg0: i32, %arg1: i32) -> (i32, i32) {
    %c0_i32 = arith.constant 0 : i32
    %c0_i32_0 = arith.constant 0 : i32
    return %arg0, %c0_i32 : i32, i32
  }
  func.func @transform_1(%arg0: i32, %arg1: i32) -> (i32, i32) {
    %c0_i32 = arith.constant 0 : i32
    %c0_i32_0 = arith.constant 0 : i32
    return %arg0, %c0_i32 : i32, i32
  }
  func.func @transform_2(%arg0: i32, %arg1: i32) -> (i32, i32) {
    %c0_i32 = arith.constant 0 : i32
    %c0_i32_0 = arith.constant 0 : i32
    %c0_i32_1 = arith.constant 0 : i32
    return %c0_i32, %c0_i32_0 : i32, i32
  }
  func.func @transform_3(%arg0: i32, %arg1: i32) -> (i32, i32) {
    %c0_i32 = arith.constant 0 : i32
    %c0_i32_0 = arith.constant 0 : i32
    return %arg1, %c0_i32 : i32, i32
  }
  func.func @transform_4(%arg0: i32, %arg1: i32) -> (i32, i32) {
    %c0_i32 = arith.constant 0 : i32
    return %arg0, %arg1 : i32, i32
  }
}

</mosaic_0001>

<bundles_post_ra>
// kernel: tpu_custom_call.1
= control target key start
LH: loop header
LB: loop body
LE: loop exit
PB: predicated region body
PF: predicated region fallthrough
CT: control target
= control target key end

     0   :  { %vm38_vm0 = vcmask 261120   ;;  %s487_s0 = inlined_call_operand.vmem [shape: s32[8,1], index: 0, kind: input, shape index: {}]   ;;  %s488_s1 = inlined_call_operand.vmem [shape: f32[8,32], index: 1, kind: input, shape index: {}]   ;;  %s489_s2 = inlined_call_operand.vmem [shape: f32[1,32], index: 2, kind: input, shape index: {}]   ;;  %s490_s3 = inlined_call_operand.vmem [shape: f32[128,32], index: 3, kind: input, shape index: {}]   ;;  %s491_s4 = inlined_call_operand.hbm [shape: f32[8,128], index: 4, kind: output, shape index: {}]  }
   0x1   :  { %v18_v0 = vld [vmem:[%s488_s1] sm:$0xff] }
   0x2   :  { %9 = vsyncpa [#allocation3], 0  ;;  %v37_v1 = vmul.f32 %v18_v0, %v18_v0  ;;  %v20_v4 = vld [vmem:[%s490_s3] sm:$0xff]  ;;  %v21_v5 = vld [vmem:[%s490_s3 + $0x8] sm:$0xff]  ;;  %v363_v6 = vmov 0.0|0.0   ;;  %vm364_vm2 = vmmov 0   ;;  %v197_v50 = vlaneseq }
   0x3   :  { %vm399_vm1 = vmpackc.low %vm38_vm0, %vm38_vm0  ;;  %294 = vmatprep.subr.bf16.mxu0 %v363_v6  ;;  %v295_v7 = vpack.c.bf16 %v21_v5, %v20_v4  ;;  %v22_v8 = vld [vmem:[%s490_s3 + $0x10] sm:$0xff]  ;;  %v23_v9 = vld [vmem:[%s490_s3 + $0x18] sm:$0xff]  ;;  %v365_v36 = vmov 0.0   ;;  %v366_v39 = vmov 0  }
   0x4   :  { %v39_v2 = vsel %vm38_vm0, %v37_v1, 0.0  ;;  %v299_v10 = vpack.c.bf16 %v23_v9, %v22_v8  ;;  %v24_v11 = vld [vmem:[%s490_s3 + $0x20] sm:$0xff]  ;;  %v25_v12 = vld [vmem:[%s490_s3 + $0x28] sm:$0xff]  ;;  %v26_v14 = vld [vmem:[%s490_s3 + $0x30] sm:$0xff]  ;;  %291 = vmatprep.mubr.msk.f32.mxu0 %vm364_vm2, %v365_v36  ;;  %331 = vset.pattern.permute.xlu1 %v366_v39  ;;  %v198_v54 = vand.u32 127, %v197_v50 }
   0x5   :  { %40 = vadd.xlane.f32.xlu0 %v39_v2  ;;  %297 = vmatpush3.bf16.xpose.msk.msra.mxu0 %vm399_vm1, %v295_v7  ;;  %v303_v13 = vpack.c.bf16 %v25_v12, %v24_v11  ;;  %v27_v15 = vld [vmem:[%s490_s3 + $0x38] sm:$0xff]  ;;  %v28_v17 = vld [vmem:[%s490_s3 + $0x40] sm:$0xff]  ;;  %v29_v18 = vld [vmem:[%s490_s3 + $0x48] sm:$0xff] }
   0x6   :  { %298 = vmatprep.subr.bf16.mxu0 %v363_v6  ;;  %v307_v16 = vpack.c.bf16 %v27_v15, %v26_v14  ;;  %v311_v19 = vpack.c.bf16 %v29_v18, %v28_v17  ;;  %v30_v20 = vld [vmem:[%s490_s3 + $0x50] sm:$0xff]  ;;  %v31_v21 = vld [vmem:[%s490_s3 + $0x58] sm:$0xff]  ;;  %v223_v26 = vld [vmem:[%s489_s2] ss:$0 sm:$0xff]  ;;  %332 = vset.pattern.permute.xlu0 %v366_v39 }
   0x7   :  { %v315_v22 = vpack.c.bf16 %v31_v21, %v30_v20  ;;  %v32_v31 = vld [vmem:[%s490_s3 + $0x60] sm:$0xff]  ;;  %v33_v32 = vld [vmem:[%s490_s3 + $0x68] sm:$0xff]  ;;  %v34_v34 = vld [vmem:[%s490_s3 + $0x70] sm:$0xff] }
   0x8   :  { %v319_v33 = vpack.c.bf16 %v33_v32, %v32_v31  ;;  %v35_v35 = vld [vmem:[%s490_s3 + $0x78] sm:$0xff]  ;;  %v36_v38 = vld [vmem:[%s487_s0] sm:$0xff]  ;;  %s367_s0 = smov [#allocation2]  }
   0x9   :  { %v323_v37 = vpack.c.bf16 %v35_v35, %v34_v34  ;;  %203 = vperm.xlu1 %331, %v36_v38   ;;  %s215_s3 = sshll.u32 %s367_s0, 4  ;;  %s216_s3 = int_to_ptr.vmem [resolvable:$true] %s215_s3 }
   0xa   :  { %s339_s24 = scalar_lea.vmem %s216_s3, 128  ;;  %p344_p1 = scmp.lt.s32.totalorder %s216_s3, %s216_s3 }
   0xb   :  { %p340_p0 = scmp.ne.s32.totalorder %s216_s3, %s339_s24  ;;  %p345_p2 = scmp.lt.s32.totalorder %s339_s24, %s339_s24 }
   0xd   :  { %301 = vmatpush3.bf16.xpose.msk.msra.mxu0 %vm399_vm1, %v299_v10  ;;  %p346_p3 = por %p345_p2, %p344_p1 }
   0xe   :  { %302 = vmatprep.subr.bf16.mxu0 %v363_v6 }
   0xf   :  { %p347_p4 = pnand %p346_p3, %p340_p0 }
  0x15   :  { %305 = vmatpush3.bf16.xpose.msk.msra.mxu0 %vm399_vm1, %v303_v13 }
  0x16   :  { %306 = vmatprep.subr.bf16.mxu0 %v363_v6 }
  0x1d   :  { %309 = vmatpush3.bf16.xpose.msk.msra.mxu0 %vm399_vm1, %v307_v16 }
  0x1e   :  { %310 = vmatprep.subr.bf16.mxu0 %v363_v6 }
  0x25   :  { %313 = vmatpush3.bf16.xpose.msk.msra.mxu0 %vm399_vm1, %v311_v19 }
  0x26   :  { %314 = vmatprep.subr.bf16.mxu0 %v363_v6 }
  0x2d   :  { %317 = vmatpush3.bf16.xpose.msk.msra.mxu0 %vm399_vm1, %v315_v22 }
  0x2e   :  { %318 = vmatprep.subr.bf16.mxu0 %v363_v6 }
  0x35   :  { %321 = vmatpush3.bf16.xpose.msk.msra.mxu0 %vm399_vm1, %v319_v33 }
  0x36   :  { %322 = vmatprep.subr.bf16.mxu0 %v363_v6 }
  0x3d   :  { %325 = vmatpush3.bf16.xpose.msk.msra.mxu0 %vm399_vm1, %v323_v37 }
  0x88   :  { %v204_v56 = vpop.permute.xlu1 %203 }
  0x89   :  { %vm205_vm5 = vcmp.eq.s32.totalorder %v198_v54, %v204_v56 }
  0x92   :  { %v41_v23 = vpop.xlane.xlu0 %40 }
  0x93   :  { %v42_v24 = vmax.f32 %v41_v23, 1e-24 }
  0x95   :  { %333 = vrsqrt.f32 %v42_v24 }
  0x9f   :  { %v334_v25 = vpop.eup %333 }
  0xa0   :  { %v44_v27 = vmul.f32 %v334_v25, %v18_v0 }
  0xa2   :  { %v51_v28 = vsub.f32 %v44_v27, %v223_v26 }
  0xa4   :  { %v52_v29 = vmul.f32 %v51_v28, %v51_v28 }
  0xa6   :  { %v53_v30 = vsel %vm38_vm0, %v52_v29, 0.0 }
  0xa7   :  { %54 = vadd.xlane.f32.xlu0 %v53_v30 }
 0x134   :  { %v55_v40 = vpop.xlane.xlu0 %54 }
 0x135   :  { %v56_v41 = vmax.f32 %v55_v40, 1e-24 }
 0x137   :  { %335 = vrsqrt.f32 %v56_v41 }
 0x141   :  { %v336_v42 = vpop.eup %335 }
 0x142   :  { %v58_v43 = vmul.f32 %v336_v42, %v51_v28 }
 0x144   :  { %292 = vmatmul.mubr.msk.f32.vlgmr.msra.gmra.mrb[0].mxu0 %vm38_vm0, %v58_v43 }
 0x217   :  { %v176_v44 = vpop.f32.mrb[0].mxu0 }
 0x218   :  { %v180_v45 = vmul.f32 %v176_v44, %v176_v44  ;;  %v293_v46 = vpop.f32.mrb[1].mxu0  ;;  %v191_v58 = vmul.f32 0.87758255, %v176_v44  ;;  %v241_v60 = vadd.f32 -0.23971277, %v176_v44 }
 0x219   :  { %vm194_vm6 = vcmp.gt.f32.partialorder %v176_v44, -0.87758255 }
 0x21a   :  { %v181_v47 = vsub.f32 1.0, %v180_v45 }
 0x21c   :  { %v182_v48 = vmax.f32 %v181_v47, 0.0 }
 0x21e   :  { %v183_v49 = vmin.f32 %v182_v48, 1.0 }
 0x220   :  { %337 = vrsqrt.f32 %v183_v49  ;;  %vm186_vm3 = vcmp.eq.f32.partialorder %v183_v49, inf  ;;  %v189_v53 = vand.u32 2147483648, %v183_v49  ;;  %vm188_vm4 = vcmp.eq.f32.partialorder %v183_v49, 0.0 }
 0x22a   :  { %v338_v51 = vpop.eup %337 }
 0x22b   :  { %v185_v52 = vmul.f32 %v338_v51, %v183_v49 }
 0x22d   :  { %v187_v55 = vsel %vm186_vm3, %v183_v49, %v185_v52 }
 0x22e   :  { %v190_v57 = vsel %vm188_vm4, %v189_v53, %v187_v55 }
 0x22f   :  { %v192_v59 = vmul.f32 0.47942555, %v190_v57 }
 0x231   :  { %v193_v61 = vsub.f32 %v191_v58, %v192_v59 }
 0x233   :  { %v196_v62 = vsel %vm194_vm6, %v193_v61, %v241_v60 }
 0x234   :  { %v206_v63 = vsel %vm205_vm5, %v196_v62, %v176_v44 }
 0x235   :  { %v207_v0 = vmul.f32 30.0, %v206_v63 }
 0x237   :  { %208 = vst [vmem:[#allocation2] sm:$0xff] %v207_v0 }
 0x238   :  { %350 = shalt.err (!%p347_p4)
}
 0x239   :  { %s351_s27 = scalar_lea.hbm %s491_s4, 128 }
 0x23a   :  { %p352_p5 = scmp.ne.s32.totalorder %s491_s4, %s351_s27  ;;  %p355_p6 = scmp.lt.u32.totalorder %s351_s27, %s491_s4 }
 0x23c   :  { %p357_p7 = pnand %p355_p6, %p352_p5 }
 0x23e   :  { %360 = shalt.err (!%p357_p7)
}
 0x23f   :  { %218 = dma.vmem_to_hbm [thread:$0]  %s216_s3, 128, %s491_s4, [#allocation3]  }
 0x240   :  { %361 = dma.done.wait [#allocation3], 128  }
 0x241   :  { %362 = vsyncadd [#allocation3], 4294967168 }
 0x242   :  { %222 = vsyncpa [#allocation3], 1 }

</bundles_post_ra>
